<compile_context>
chip_gen: v5e
topology: v5e:2x2
jax: 0.10.0
libtpu: 0.0.40
codegen_flags: <defaults>
</compile_context>

<pallas_src>
import functools

import jax
import jax.numpy as jnp
from jax.experimental import pallas as pl
from jax.experimental.pallas import tpu as pltpu

EPS = 1e-5
LANE = 128
SUBLANE = 8


def _round_up(v, m):
    return (v + m - 1) // m * m


def _layernorm_kernel(x_ref, g_ref, b_ref, o_ref, *, n_valid, needs_mask):
    # x_ref/o_ref: (TN, Fp)   g_ref/b_ref: (1, Fp)
    x = x_ref[...].astype(jnp.float32)

    if needs_mask:
        lane = jax.lax.broadcasted_iota(jnp.int32, x.shape, 1)
        mask = (lane < n_valid).astype(jnp.float32)
        xs = x * mask
    else:
        xs = x

    mean = jnp.sum(xs, axis=-1, keepdims=True) * (1.0 / n_valid)     # (TN, 1)
    d = x - mean
    if needs_mask:
        d = d * mask
    var = jnp.sum(d * d, axis=-1, keepdims=True) * (1.0 / max(n_valid - 1, 1))
    # torch.std is unbiased (N-1); eps added to std (matches the module).
    inv = pl.reciprocal(jnp.sqrt(var) + EPS, approx=False)            # (TN, 1)

    # folded normalize + per-channel affine: y = d * (inv * gamma) + beta
    y = d * (inv * g_ref[...]) + b_ref[...]
    o_ref[...] = y.astype(o_ref.dtype)


def layer_norm(x, gamma, beta):
    """x: (N, C, H, W) NCHW.  gamma/beta: (C,).  Matches the PyTorch module.

    For N == 1 the PyTorch module normalizes over the whole flattened tensor,
    which equals the per-sample path, so one kernel covers both branches.
    """
    N, C, H, W = x.shape
    HW = H * W
    F = C * HW
    Fp = _round_up(F, LANE)                       # lane-dense last dim

    # Row tile: as many rows as fit ~2 MiB of fp32 input per block (keeps
    # double-buffered in+out + temporaries well under every generation's
    # scoped VMEM), rounded to a multiple of 8, capped by the padded batch.
    rows_budget = max(SUBLANE, (2 * 1024 * 1024) // (Fp * 4))
    rows_budget = max(SUBLANE, (rows_budget // SUBLANE) * SUBLANE)
    TN = min(rows_budget, _round_up(N, SUBLANE))
    Np = _round_up(N, TN)

    x2 = x.reshape(N, F)
    if (Np != N) or (Fp != F):
        x2 = jnp.pad(x2, ((0, Np - N), (0, Fp - F)))

    # Pre-broadcast per-channel affine params to one lane-dense feature row.
    g_row = jnp.repeat(gamma.astype(jnp.float32), HW)
    b_row = jnp.repeat(beta.astype(jnp.float32), HW)
    if Fp != F:
        g_row = jnp.pad(g_row, (0, Fp - F))
        b_row = jnp.pad(b_row, (0, Fp - F))
    g_row = g_row.reshape(1, Fp)
    b_row = b_row.reshape(1, Fp)

    kernel = functools.partial(
        _layernorm_kernel, n_valid=F, needs_mask=(Fp != F))

    out = pl.pallas_call(
        kernel,
        out_shape=jax.ShapeDtypeStruct((Np, Fp), x.dtype),
        grid_spec=pltpu.PrefetchScalarGridSpec(
            num_scalar_prefetch=0,
            grid=(Np // TN,),
            in_specs=[
                pl.BlockSpec((TN, Fp), lambda i: (i, 0)),
                pl.BlockSpec((1, Fp), lambda i: (0, 0)),   # resident gamma row
                pl.BlockSpec((1, Fp), lambda i: (0, 0)),   # resident beta row
            ],
            out_specs=pl.BlockSpec((TN, Fp), lambda i: (i, 0)),
        ),
        compiler_params=pltpu.CompilerParams(
            dimension_semantics=("parallel",),
            vmem_limit_bytes=32 * 1024 * 1024,
        ),
    )(x2, g_row, b_row)

    return out[:N, :F].reshape(N, C, H, W)


def _reference(x, gamma, beta):
    N = x.shape[0]
    xf = x.reshape(N, -1).astype(jnp.float32)
    mean = xf.mean(axis=1)
    var = jnp.sum((xf - mean[:, None]) ** 2, axis=1) / (xf.shape[1] - 1)
    std = jnp.sqrt(var)
    shape = (N,) + (1,) * (x.ndim - 1)
    y = (x - mean.reshape(shape)) / (std.reshape(shape) + EPS)
    gshape = (1, -1) + (1,) * (x.ndim - 2)
    return y * gamma.reshape(gshape) + beta.reshape(gshape)


if __name__ == "__main__":
    key = jax.random.PRNGKey(0)
    kx, kg = jax.random.split(key)

    N, C, H, W = 2, 4, 16, 16
    x = jax.random.normal(kx, (N, C, H, W), dtype=jnp.float32)
    # deterministic parameter init (PyTorch: gamma ~ U[0,1), beta = 0)
    gamma = jax.random.uniform(kg, (C,), dtype=jnp.float32)
    beta = jnp.zeros((C,), dtype=jnp.float32)

    out = layer_norm(x, gamma, beta)
    jax.block_until_ready(out)

    ref = _reference(x, gamma, beta)
    if not jnp.allclose(out, ref, atol=1e-5, rtol=1e-5):
        raise AssertionError("Pallas LayerNorm mismatch vs reference")

    print("KERNEL_OK")
</pallas_src>

<mosaic_0001>
module attributes {stable_mosaic.version = 11 : i64} {
  func.func @_layernorm_kernel(%arg0: i32, %arg1: memref<8x1024xf32, #tpu.memory_space<vmem>>, %arg2: memref<1x1024xf32, #tpu.memory_space<vmem>>, %arg3: memref<1x1024xf32, #tpu.memory_space<vmem>>, %arg4: memref<8x1024xf32, #tpu.memory_space<vmem>>) attributes {dimension_semantics = [#tpu.dimension_semantics<parallel>], iteration_bounds = array<i64: 1>, scalar_prefetch = 0 : i64, scratch_operands = 0 : i64, tpu.core_type = #tpu.core_type<tc>, window_params = [{transform_indices = @transform_0, window_bounds = array<i64: 8, 1024>}, {pipeline_mode = #tpu.pipeline_mode<synchronous>, transform_indices = @transform_1, window_bounds = array<i64: 1, 1024>}, {pipeline_mode = #tpu.pipeline_mode<synchronous>, transform_indices = @transform_2, window_bounds = array<i64: 1, 1024>}, {transform_indices = @transform_3, window_bounds = array<i64: 8, 1024>}]} {
    %c0 = arith.constant 0 : index
    %c0_0 = arith.constant 0 : index
    %0 = vector.load %arg1[%c0, %c0_0] : memref<8x1024xf32, #tpu.memory_space<vmem>>, vector<8x1024xf32>
    %cst = arith.constant dense<0.000000e+00> : vector<8xf32>
    %1 = vector.multi_reduction <add>, %0, %cst [1] : vector<8x1024xf32> to vector<8xf32>
    %2 = vector.shape_cast %1 : vector<8xf32> to vector<8x1xf32>
    %cst_1 = arith.constant 9.765625E-4 : f32
    %3 = vector.broadcast %cst_1 : f32 to vector<8x1xf32>
    %4 = arith.mulf %2, %3 : vector<8x1xf32>
    %5 = vector.broadcast %4 : vector<8x1xf32> to vector<8x1024xf32>
    %6 = arith.subf %0, %5 : vector<8x1024xf32>
    %7 = arith.mulf %6, %6 : vector<8x1024xf32>
    %cst_2 = arith.constant dense<0.000000e+00> : vector<8xf32>
    %8 = vector.multi_reduction <add>, %7, %cst_2 [1] : vector<8x1024xf32> to vector<8xf32>
    %9 = vector.shape_cast %8 : vector<8xf32> to vector<8x1xf32>
    %cst_3 = arith.constant 9.77517105E-4 : f32
    %10 = vector.broadcast %cst_3 : f32 to vector<8x1xf32>
    %11 = arith.mulf %9, %10 : vector<8x1xf32>
    %12 = math.sqrt %11 : vector<8x1xf32>
    %cst_4 = arith.constant 9.99999974E-6 : f32
    %13 = vector.broadcast %cst_4 : f32 to vector<8x1xf32>
    %14 = arith.addf %12, %13 : vector<8x1xf32>
    %15 = tpu.reciprocal %14 : vector<8x1xf32> -> vector<8x1xf32>
    %c0_5 = arith.constant 0 : index
    %c0_6 = arith.constant 0 : index
    %16 = vector.load %arg2[%c0_5, %c0_6] : memref<1x1024xf32, #tpu.memory_space<vmem>>, vector<1x1024xf32>
    %17 = vector.broadcast %15 : vector<8x1xf32> to vector<8x1024xf32>
    %18 = vector.broadcast %16 : vector<1x1024xf32> to vector<8x1024xf32>
    %19 = arith.mulf %17, %18 : vector<8x1024xf32>
    %20 = arith.mulf %6, %19 : vector<8x1024xf32>
    %c0_7 = arith.constant 0 : index
    %c0_8 = arith.constant 0 : index
    %21 = vector.load %arg3[%c0_7, %c0_8] : memref<1x1024xf32, #tpu.memory_space<vmem>>, vector<1x1024xf32>
    %22 = vector.broadcast %21 : vector<1x1024xf32> to vector<8x1024xf32>
    %23 = arith.addf %20, %22 : vector<8x1024xf32>
    %c0_9 = arith.constant 0 : index
    %c0_10 = arith.constant 0 : index
    %24 = vector.load %arg4[%c0_9, %c0_10] : memref<8x1024xf32, #tpu.memory_space<vmem>>, vector<8x1024xf32>
    tpu.vector_store %arg4[%c0_9, %c0_10], %23 {strides = array<i32>} : memref<8x1024xf32, #tpu.memory_space<vmem>>, vector<8x1024xf32>,
    return
  }
  func.func @transform_0(%arg0: i32) -> (i32, i32) {
    %c0_i32 = arith.constant 0 : i32
    %c0_i32_0 = arith.constant 0 : i32
    return %arg0, %c0_i32 : i32, i32
  }
  func.func @transform_1(%arg0: i32) -> (i32, i32) {
    %c0_i32 = arith.constant 0 : i32
    %c0_i32_0 = arith.constant 0 : i32
    %c0_i32_1 = arith.constant 0 : i32
    return %c0_i32, %c0_i32_0 : i32, i32
  }
  func.func @transform_2(%arg0: i32) -> (i32, i32) {
    %c0_i32 = arith.constant 0 : i32
    %c0_i32_0 = arith.constant 0 : i32
    %c0_i32_1 = arith.constant 0 : i32
    return %c0_i32, %c0_i32_0 : i32, i32
  }
  func.func @transform_3(%arg0: i32) -> (i32, i32) {
    %c0_i32 = arith.constant 0 : i32
    %c0_i32_0 = arith.constant 0 : i32
    return %arg0, %c0_i32 : i32, i32
  }
}

</mosaic_0001>

<bundles_post_ra>
// kernel: tpu_custom_call.1
= control target key start
LH: loop header
LB: loop body
LE: loop exit
PB: predicated region body
PF: predicated region fallthrough
CT: control target
= control target key end

     0   :  { %8 = vsyncpa [#allocation3], 0  ;;  %s399_s0 = inlined_call_operand.hbm [shape: f32[8,1024], index: 0, kind: input, shape index: {}]   ;;  %s400_s1 = inlined_call_operand.hbm [shape: f32[1,1024], index: 1, kind: input, shape index: {}]   ;;  %s401_s2 = inlined_call_operand.hbm [shape: f32[1,1024], index: 2, kind: input, shape index: {}]   ;;  %s402_s3 = inlined_call_operand.hbm [shape: f32[8,1024], index: 3, kind: output, shape index: {}]  }
   0x1   :  { %9 = vsyncpa [#allocation6], 0  ;;  %s27_s14 = sshll.u32 %s400_s1, 4  ;;  %s28_s14 = int_to_ptr.hbm [resolvable:$true] %s27_s14 }
   0x2   :  { %10 = vsyncpa [#allocation4], 0  ;;  %s323_s15 = smov [#allocation5]   ;;  %s16_s19 = sshll.u32 %s399_s0, 4  ;;  %s17_s19 = int_to_ptr.hbm [resolvable:$true] %s16_s19 }
   0x3   :  { %s29_s16 = sshll.u32 %s323_s15, 4  ;;  %s324_s20 = smov [#allocation2]   ;;  %s30_s16 = int_to_ptr.vmem [resolvable:$true] %s29_s16 }
   0x4   :  { %32 = dma.hbm_to_vmem [thread:$0]  %s28_s14, 128, %s30_s16, [#allocation6]  }
   0x5   :  { %s18_s21 = sshll.u32 %s324_s20, 4  ;;  %s38_s24 = sshll.u32 %s401_s2, 4  ;;  %s19_s21 = int_to_ptr.vmem [resolvable:$true] %s18_s21  ;;  %s39_s24 = int_to_ptr.hbm [resolvable:$true] %s38_s24 }
   0x6   :  { %21 = dma.hbm_to_vmem [thread:$0]  %s17_s19, 1024, %s19_s21, [#allocation3]  }
   0x7   :  { %s325_s1 = smov [#allocation7]  }
   0x8   :  { %s40_s25 = sshll.u32 %s325_s1, 4  ;;  %s41_s25 = int_to_ptr.vmem [resolvable:$true] %s40_s25 }
   0x9   :  { %43 = dma.hbm_to_vmem [thread:$0]  %s39_s24, 128, %s41_s25, [#allocation6]  }
   0xa   :  { %317 = dma.done.wait [#allocation3], 1024  }
   0xb   :  { %318 = vsyncadd [#allocation3], 4294966272 }
   0xc   :  { %319 = dma.done.wait [#allocation6], 256  }
   0xd   :  { %320 = vsyncadd [#allocation6], 4294967040  ;;  %v56_v0 = vld [vmem:[#allocation2] sm:$0xff]  ;;  %v57_v1 = vld [vmem:[#allocation2 + $0x8] sm:$0xff]  ;;  %s326_s0 = smov [#allocation8]   ;;  %s202_s28 = sshll.u32 %s402_s3, 4  ;;  %s203_s28 = int_to_ptr.hbm [resolvable:$true] %s202_s28 }
   0xe   :  { %v58_v2 = vld [vmem:[#allocation2 + $0x10] sm:$0xff]  ;;  %v64_v3 = vadd.f32 %v57_v1, %v56_v0  ;;  %v59_v4 = vld [vmem:[#allocation2 + $0x18] sm:$0xff]  ;;  %v60_v6 = vld [vmem:[#allocation2 + $0x20] sm:$0xff]  ;;  %s200_s2 = sshll.u32 %s326_s0, 4  ;;  %s201_s2 = int_to_ptr.vmem [resolvable:$true] %s200_s2 }
   0xf   :  { %v61_v8 = vld [vmem:[#allocation2 + $0x28] sm:$0xff]  ;;  %v62_v10 = vld [vmem:[#allocation2 + $0x30] sm:$0xff]  ;;  %v63_v12 = vld [vmem:[#allocation2 + $0x38] sm:$0xff] }
  0x10   :  { %v65_v5 = vadd.f32 %v64_v3, %v58_v2  ;;  %v127_v56 = vld [vmem:[#allocation5] sm:$0xff]  ;;  %v161_v63 = vld [vmem:[#allocation7] sm:$0xff] }
  0x11   :  { %v129_v60 = vperm.slane %v127_v56, 0  ;;  %v130_v61 = vperm.slane %v127_v56, 1  ;;  %v131_v62 = vperm.slane %v127_v56, 2 }
  0x12   :  { %v66_v7 = vadd.f32 %v65_v5, %v59_v4  ;;  %v135_v5 = vperm.slane %v127_v56, 6 }
  0x14   :  { %v67_v9 = vadd.f32 %v66_v7, %v60_v6 }
  0x16   :  { %v68_v11 = vadd.f32 %v67_v9, %v61_v8  ;;  %v164_v9 = vperm.slane %v161_v63, 1 }
  0x18   :  { %v69_v13 = vadd.f32 %v68_v11, %v62_v10  ;;  %v165_v11 = vperm.slane %v161_v63, 2 }
  0x1a   :  { %v70_v14 = vadd.f32 %v69_v13, %v63_v12  ;;  %v167_v13 = vperm.slane %v161_v63, 4 }
  0x1c   :  { %71 = vadd.xlane.f32.xlu0 %v70_v14 }
  0x8f   :  { %v72_v15 = vpop.xlane.xlu0 %71 }
  0x90   :  { %v73_v16 = vmul.f32 0.0009765625, %v72_v15 }
  0x92   :  { %v356_v17 = vsub.f32 %v56_v0, %v73_v16  ;;  %v358_v18 = vsub.f32 %v57_v1, %v73_v16  ;;  %v360_v19 = vsub.f32 %v58_v2, %v73_v16  ;;  %v362_v20 = vsub.f32 %v59_v4, %v73_v16 }
  0x93   :  { %v368_v23 = vsub.f32 %v60_v6, %v73_v16  ;;  %v372_v26 = vsub.f32 %v61_v8, %v73_v16  ;;  %v376_v29 = vsub.f32 %v62_v10, %v73_v16  ;;  %v380_v32 = vsub.f32 %v63_v12, %v73_v16 }
  0x94   :  { %v82_v21 = vmul.f32 %v356_v17, %v356_v17  ;;  %v83_v22 = vmul.f32 %v358_v18, %v358_v18  ;;  %v84_v24 = vmul.f32 %v360_v19, %v360_v19  ;;  %v85_v27 = vmul.f32 %v362_v20, %v362_v20 }
  0x95   :  { %v86_v30 = vmul.f32 %v368_v23, %v368_v23  ;;  %v87_v33 = vmul.f32 %v372_v26, %v372_v26  ;;  %v88_v35 = vmul.f32 %v376_v29, %v376_v29  ;;  %v89_v37 = vmul.f32 %v380_v32, %v380_v32 }
  0x96   :  { %v90_v25 = vadd.f32 %v83_v22, %v82_v21  ;;  %v132_v1 = vperm.slane %v127_v56, 3  ;;  %v133_v2 = vperm.slane %v127_v56, 4  ;;  %v134_v4 = vperm.slane %v127_v56, 5 }
  0x97   :  { %v136_v6 = vperm.slane %v127_v56, 7  ;;  %v163_v8 = vperm.slane %v161_v63, 0  ;;  %v166_v12 = vperm.slane %v161_v63, 3 }
  0x98   :  { %v91_v28 = vadd.f32 %v90_v25, %v84_v24 }
  0x9a   :  { %v92_v31 = vadd.f32 %v91_v28, %v85_v27 }
  0x9c   :  { %v93_v34 = vadd.f32 %v92_v31, %v86_v30 }
  0x9e   :  { %v94_v36 = vadd.f32 %v93_v34, %v87_v33 }
  0xa0   :  { %v95_v38 = vadd.f32 %v94_v36, %v88_v35  ;;  %v168_v36 = vperm.slane %v161_v63, 5 }
  0xa2   :  { %v96_v39 = vadd.f32 %v95_v38, %v89_v37  ;;  %v169_v37 = vperm.slane %v161_v63, 6 }
  0xa4   :  { %97 = vadd.xlane.f32.xlu0 %v96_v39 }
 0x117   :  { %v98_v40 = vpop.xlane.xlu0 %97 }
 0x118   :  { %v99_v41 = vmul.f32 0.0009775171, %v98_v40 }
 0x11a   :  { %217 = vrsqrt.f32 %v99_v41  ;;  %vm107_vm0 = vcmp.eq.f32.partialorder %v99_v41, inf  ;;  %v110_v49 = vand.u32 2147483648, %v99_v41  ;;  %vm109_vm1 = vcmp.eq.f32.partialorder %v99_v41, 0.0 }
 0x120   :  { %v218_v42 = vpop.eup %217 }
 0x121   :  { %v101_v43 = vmul.f32 %v218_v42, %v99_v41 }
 0x123   :  { %v102_v44 = vmul.f32 %v218_v42, %v101_v43 }
 0x125   :  { %v103_v45 = vmul.f32 0.5, %v102_v44 }
 0x127   :  { %v104_v46 = vsub.f32 1.5, %v103_v45 }
 0x129   :  { %v105_v47 = vmul.f32 %v218_v42, %v104_v46 }
 0x12b   :  { %v106_v48 = vmul.f32 %v105_v47, %v99_v41 }
 0x12d   :  { %v108_v50 = vsel %vm107_vm0, %v99_v41, %v106_v48 }
 0x12e   :  { %v111_v51 = vsel %vm109_vm1, %v110_v49, %v108_v50 }
 0x12f   :  { %v112_v52 = vadd.f32 1e-05, %v111_v51 }
 0x131   :  { %219 = vrcp.f32 %v112_v52  ;;  %v124_v57 = vand.u32 2147483648, %v112_v52  ;;  %v122_v59 = vand.u32 2147483647, %v112_v52  ;;  %vm118_vm3 = vweird.f32 %v112_v52 }
 0x133   :  { %v125_v3 = vor.u32 1.1754944e-38, %v124_v57  ;;  %vm123_vm5 = vcmp.eq.f32.partialorder %v122_v59, 8.507059e+37 }
 0x137   :  { %v220_v53 = vpop.eup %219 }
 0x138   :  { %v114_v54 = vmul.f32 %v220_v53, %v112_v52  ;;  %vm119_vm2 = vweird.f32 %v220_v53 }
 0x139   :  { %vm120_vm4 = vmor %vm118_vm3, %vm119_vm2 }
 0x13a   :  { %v115_v55 = vsub.f32 1.0, %v114_v54 }
 0x13c   :  { %v116_v58 = vmul.f32 %v220_v53, %v115_v55 }
 0x13e   :  { %v117_v0 = vadd.f32 %v220_v53, %v116_v58 }
 0x140   :  { %v121_v7 = vsel %vm120_vm4, %v220_v53, %v117_v0 }
 0x141   :  { %v126_v10 = vsel %vm123_vm5, %v125_v3, %v121_v7 }
 0x142   :  { %v145_v14 = vmul.f32 %v129_v60, %v126_v10  ;;  %v146_v15 = vmul.f32 %v130_v61, %v126_v10  ;;  %v147_v16 = vmul.f32 %v131_v62, %v126_v10  ;;  %v148_v21 = vmul.f32 %v132_v1, %v126_v10 }
 0x143   :  { %v149_v22 = vmul.f32 %v133_v2, %v126_v10  ;;  %v150_v24 = vmul.f32 %v134_v4, %v126_v10  ;;  %v151_v25 = vmul.f32 %v135_v5, %v126_v10  ;;  %v152_v27 = vmul.f32 %v136_v6, %v126_v10 }
 0x144   :  { %v153_v28 = vmul.f32 %v145_v14, %v356_v17  ;;  %v154_v30 = vmul.f32 %v146_v15, %v358_v18  ;;  %v155_v31 = vmul.f32 %v147_v16, %v360_v19  ;;  %v156_v33 = vmul.f32 %v148_v21, %v362_v20 }
 0x145   :  { %v157_v34 = vmul.f32 %v149_v22, %v368_v23  ;;  %v158_v35 = vmul.f32 %v150_v24, %v372_v26  ;;  %v159_v38 = vmul.f32 %v151_v25, %v376_v29  ;;  %v160_v42 = vmul.f32 %v152_v27, %v380_v32 }
 0x146   :  { %v179_v39 = vadd.f32 %v163_v8, %v153_v28  ;;  %v180_v40 = vadd.f32 %v164_v9, %v154_v30  ;;  %v181_v41 = vadd.f32 %v165_v11, %v155_v31  ;;  %v170_v17 = vperm.slane %v161_v63, 7 }
 0x147   :  { %v182_v43 = vadd.f32 %v166_v12, %v156_v33  ;;  %v183_v18 = vadd.f32 %v167_v13, %v157_v34  ;;  %v184_v19 = vadd.f32 %v168_v36, %v158_v35  ;;  %v185_v20 = vadd.f32 %v169_v37, %v159_v38 }
 0x148   :  { %187 = vst [vmem:[#allocation8] sm:$0xff] %v179_v39  ;;  %v186_v23 = vadd.f32 %v170_v17, %v160_v42 }
 0x149   :  { %188 = vst [vmem:[#allocation8 + $0x8] sm:$0xff] %v180_v40 }
 0x14a   :  { %189 = vst [vmem:[#allocation8 + $0x10] sm:$0xff] %v181_v41 }
 0x14b   :  { %190 = vst [vmem:[#allocation8 + $0x18] sm:$0xff] %v182_v43 }
 0x14c   :  { %191 = vst [vmem:[#allocation8 + $0x20] sm:$0xff] %v183_v18 }
 0x14d   :  { %192 = vst [vmem:[#allocation8 + $0x28] sm:$0xff] %v184_v19 }
 0x14e   :  { %193 = vst [vmem:[#allocation8 + $0x30] sm:$0xff] %v185_v20 }
 0x14f   :  { %194 = vst [vmem:[#allocation8 + $0x38] sm:$0xff] %v186_v23 }
 0x150   :  { %205 = dma.vmem_to_hbm [thread:$0]  %s201_s2, 1024, %s203_s28, [#allocation4]  }
 0x151   :  { %321 = dma.done.wait [#allocation4], 1024  }
 0x152   :  { %322 = vsyncadd [#allocation4], 4294966272 }
 0x153   :  { %210 = vsyncpa [#allocation3], 1 }
 0x154   :  { %211 = vsyncpa [#allocation6], 1 }
 0x155   :  { %212 = vsyncpa [#allocation4], 1 }

</bundles_post_ra>
